<compile_context>
chip_gen: v7x
topology: tpu7x:2x2x1
jax: 0.10.0
libtpu: 0.0.40
codegen_flags: <defaults>
</compile_context>

<pallas_src>
import jax
import jax.numpy as jnp
from jax import lax
from jax.experimental import pallas as pl
from jax.experimental.pallas import tpu as pltpu


def _round_up(x, m):
    return ((x + m - 1) // m) * m


def _cdiv(a, b):
    return (a + b - 1) // b


# ------------------------------ kernel bodies --------------------------------

def _fused_kernel(x_ref, u_ref, v_ref, o_ref):
    """1-D grid over row tiles; U and V are fully VMEM-resident."""
    x = x_ref[...].astype(u_ref.dtype)                       # in-kernel cast
    h = lax.dot_general(x, u_ref[...],                       # h = x @ U^T
                        dimension_numbers=(((1,), (1,)), ((), ())),
                        preferred_element_type=jnp.float32)
    y = lax.dot_general(h.astype(v_ref.dtype), v_ref[...],   # y = h @ V^T
                        dimension_numbers=(((1,), (1,)), ((), ())),
                        preferred_element_type=jnp.float32)
    o_ref[...] = y.astype(o_ref.dtype)


def _tiled_n_kernel(x_ref, u_ref, v_ref, o_ref, h_ref):
    """2-D grid (row tiles, out_features tiles); h reused across the N axis.

    NOTE: h reuse is only correct because the N axis is the LAST (fastest)
    grid axis — do not reorder the grid.
    """
    @pl.when(pl.program_id(1) == 0)
    def _():
        x = x_ref[...].astype(u_ref.dtype)
        h = lax.dot_general(x, u_ref[...],
                            dimension_numbers=(((1,), (1,)), ((), ())),
                            preferred_element_type=jnp.float32)
        h_ref[...] = h.astype(h_ref.dtype)                   # cast once per row tile

    y = lax.dot_general(h_ref[...], v_ref[...],
                        dimension_numbers=(((1,), (1,)), ((), ())),
                        preferred_element_type=jnp.float32)
    o_ref[...] = y.astype(o_ref.dtype)


# --------------------------------- wrapper -----------------------------------

def low_rank_linear(x, u_weight, v_weight, *,
                    compute_dtype=jnp.bfloat16,
                    out_dtype=None,
                    max_tm=256, max_tn=512,
                    max_resident_v_bytes=4 * 1024 * 1024,
                    vmem_budget_bytes=20 * 1024 * 1024):
    """
    x        : (..., in_features)
    u_weight : (rank, in_features)      (PyTorch nn.Linear weight layout)
    v_weight : (out_features, rank)
    returns  : (..., out_features)  in out_dtype (default: x.dtype)
    """
    in_features = x.shape[-1]
    rank = u_weight.shape[0]
    out_features = v_weight.shape[0]
    out_dtype = x.dtype if out_dtype is None else out_dtype

    lead_shape = x.shape[:-1]
    x2d = x.reshape(-1, in_features)
    M = x2d.shape[0]

    # Lane-aligned (128) contraction / output dims; zero padding is inert on the MXU.
    in_pad = _round_up(in_features, 128)
    rank_pad = _round_up(rank, 128)
    out_pad = _round_up(out_features, 128)

    x_item = jnp.dtype(x2d.dtype).itemsize
    w_item = jnp.dtype(compute_dtype).itemsize
    o_item = jnp.dtype(out_dtype).itemsize

    # dtype-aware sublane multiple (8 rows f32, 16 bf16, 32 int8/fp8).
    sub = max(8, 32 // w_item)

    # Weights: pad + cast once (hoist to parameter init in a real model).
    # x: pad columns only if needed, keep original dtype (cast happens in-kernel).
    def _pad2(a, rows, cols):
        pr, pc = rows - a.shape[0], cols - a.shape[1]
        return jnp.pad(a, ((0, pr), (0, pc))) if (pr or pc) else a

    u_p = _pad2(u_weight, rank_pad, in_pad).astype(compute_dtype)   # (rank_pad, in_pad)
    v_p = _pad2(v_weight, out_pad, rank_pad).astype(compute_dtype)  # (out_pad, rank_pad)
    x_p = _pad2(x2d, M, in_pad)                                     # rows NOT padded

    # ---- tiling decisions ----------------------------------------------------
    v_bytes = out_pad * rank_pad * w_item
    collapse = v_bytes <= max_resident_v_bytes
    if collapse:
        tn_eff = out_pad
    else:
        tn_eff = min(max_tn, out_pad)
        if tn_eff >= 256:
            tn_eff -= tn_eff % 256          # full-width tiles for the 256-wide MXU
        if _cdiv(out_pad, tn_eff) == 1:     # only one N tile anyway -> fuse
            collapse, tn_eff = True, out_pad

    def _footprint(tm):
        f = 2 * tm * in_pad * x_item        # x block (double-buffered)
        f += 2 * rank_pad * in_pad * w_item  # U block (conservative: 2 buffers)
        f += 2 * tn_eff * rank_pad * w_item  # V block
        f += 2 * tm * tn_eff * o_item        # out block (double-buffered)
        if not collapse:
            f += tm * rank_pad * w_item      # h scratch
        return f

    # Largest sublane-aligned row tile fitting the VMEM budget.
    tm_eff = _round_up(min(max_tm, _round_up(M, sub)), sub)
    while tm_eff > sub and _footprint(tm_eff) > vmem_budget_bytes:
        tm_eff = _round_up(max(sub, tm_eff // 2), sub)

    # Keep >= 2 row tiles when possible so both v7x TensorCores run.
    if _cdiv(M, tm_eff) == 1 and M > sub:
        tm_eff = _round_up(_cdiv(M, 2), sub)

    grid_m = _cdiv(M, tm_eff)
    grid_n = 1 if collapse else _cdiv(out_pad, tn_eff)

    vmem_limit = int(min(max(_footprint(tm_eff) + (8 << 20), 32 << 20), 64 << 20))

    cost = pl.CostEstimate(
        flops=2 * M * rank * (in_features + out_features),
        transcendentals=0,
        bytes_accessed=(M * in_features * x_item
                        + rank * in_features * w_item
                        + out_features * rank * w_item
                        + M * out_features * o_item),
    )

    out_shape = jax.ShapeDtypeStruct((M, out_pad), out_dtype)

    def _invoke(use_buffered):
        # Single-buffer operands whose block index is grid-invariant.
        inv = dict(pipeline_mode=pl.Buffered(1)) if use_buffered else {}
        if collapse:
            grid = (grid_m,)
            in_specs = [
                pl.BlockSpec((tm_eff, in_pad), lambda i: (i, 0)),
                pl.BlockSpec((rank_pad, in_pad), lambda i: (0, 0), **inv),
                pl.BlockSpec((out_pad, rank_pad), lambda i: (0, 0), **inv),
            ]
            out_specs = pl.BlockSpec((tm_eff, out_pad), lambda i: (i, 0))
            scratch = []
            kernel = _fused_kernel
            dims = ("parallel",)
        else:
            grid = (grid_m, grid_n)   # N last (fastest): required for h reuse
            in_specs = [
                pl.BlockSpec((tm_eff, in_pad), lambda i, j: (i, 0)),
                pl.BlockSpec((rank_pad, in_pad), lambda i, j: (0, 0), **inv),
                pl.BlockSpec((tn_eff, rank_pad), lambda i, j: (j, 0)),
            ]
            out_specs = pl.BlockSpec((tm_eff, tn_eff), lambda i, j: (i, j))
            scratch = [pltpu.VMEM((tm_eff, rank_pad), compute_dtype)]
            kernel = _tiled_n_kernel
            dims = ("parallel", "arbitrary")

        return pl.pallas_call(
            kernel,
            out_shape=out_shape,
            grid_spec=pltpu.PrefetchScalarGridSpec(
                num_scalar_prefetch=0,
                grid=grid,
                in_specs=in_specs,
                out_specs=out_specs,
                scratch_shapes=scratch,
            ),
            compiler_params=pltpu.CompilerParams(
                dimension_semantics=dims,
                vmem_limit_bytes=vmem_limit,
            ),
            cost_estimate=cost,
        )(x_p, u_p, v_p)

    try:
        out2d = _invoke(True)
    except Exception:
        # pl.Buffered(1) (single-buffering invariant operands) unsupported on
        # this jax version -> identical kernel with default double buffering.
        out2d = _invoke(False)

    if out_pad != out_features:
        out2d = out2d[:, :out_features]
    return out2d.reshape(*lead_shape, out_features)


if __name__ == "__main__":
    # Transformer-style activation (batch, seq, hidden) through the factorized linear.
    batch, seq = 2, 8
    in_features, out_features, rank = 32, 32, 8
    init_std = 0.02

    key = jax.random.PRNGKey(0)
    kx, ku, kv = jax.random.split(key, 3)

    x = jax.random.normal(kx, (batch, seq, in_features), dtype=jnp.float32)
    # Deterministic init matching nn.init.normal_(std=init_std) semantics.
    u_weight = init_std * jax.random.normal(ku, (rank, in_features), dtype=jnp.float32)
    v_weight = init_std * jax.random.normal(kv, (out_features, rank), dtype=jnp.float32)

    # Reference (plain JAX, f32):  y = x @ U^T @ V^T.
    y_ref = (x @ u_weight.T) @ v_weight.T

    # 1) Exactness with f32 operands inside the kernel (collapsed 1-D grid).
    y_f32 = jax.block_until_ready(
        low_rank_linear(x, u_weight, v_weight, compute_dtype=jnp.float32))
    assert y_f32.shape == (batch, seq, out_features)
    assert jnp.allclose(y_f32, y_ref, atol=1e-5, rtol=1e-5)

    # 2) Default fast path: bf16 MXU operands, f32 accumulation.
    y_bf16 = jax.block_until_ready(low_rank_linear(x, u_weight, v_weight))
    assert y_bf16.shape == (batch, seq, out_features)
    assert jnp.allclose(y_bf16, y_ref, atol=2e-3, rtol=5e-2)

    # 3) Exercise the tiled-N (2-D grid + h scratch) path with a wider output.
    out2 = 384
    kv2 = jax.random.split(kv)[0]
    v_weight2 = init_std * jax.random.normal(kv2, (out2, rank), dtype=jnp.float32)
    y_ref2 = (x @ u_weight.T) @ v_weight2.T
    y_tiled = jax.block_until_ready(
        low_rank_linear(x, u_weight, v_weight2,
                        max_resident_v_bytes=0, max_tn=128))
    assert y_tiled.shape == (batch, seq, out2)
    assert jnp.allclose(y_tiled, y_ref2, atol=2e-3, rtol=5e-2)

    print("KERNEL_OK")
</pallas_src>

<mosaic_0001>
module attributes {stable_mosaic.version = 11 : i64} {
  func.func @_fused_kernel(%arg0: i32, %arg1: memref<8x128xf32, #tpu.memory_space<vmem>>, %arg2: memref<128x128xf32, #tpu.memory_space<vmem>>, %arg3: memref<128x128xf32, #tpu.memory_space<vmem>>, %arg4: memref<8x128xf32, #tpu.memory_space<vmem>>) attributes {dimension_semantics = [#tpu.dimension_semantics<parallel>], iteration_bounds = array<i64: 2>, scalar_prefetch = 0 : i64, scratch_operands = 0 : i64, tpu.core_type = #tpu.core_type<tc>, window_params = [{transform_indices = @transform_0, window_bounds = array<i64: 8, 128>}, {pipeline_mode = #tpu.pipeline_mode<synchronous>, transform_indices = @transform_1, window_bounds = array<i64: 128, 128>}, {pipeline_mode = #tpu.pipeline_mode<synchronous>, transform_indices = @transform_2, window_bounds = array<i64: 128, 128>}, {transform_indices = @transform_3, window_bounds = array<i64: 8, 128>}]} {
    %c0 = arith.constant 0 : index
    %c0_0 = arith.constant 0 : index
    %0 = vector.load %arg1[%c0, %c0_0] : memref<8x128xf32, #tpu.memory_space<vmem>>, vector<8x128xf32>
    %c0_1 = arith.constant 0 : index
    %c0_2 = arith.constant 0 : index
    %1 = vector.load %arg2[%c0_1, %c0_2] : memref<128x128xf32, #tpu.memory_space<vmem>>, vector<128x128xf32>
    %cst = arith.constant dense<0.000000e+00> : vector<8x128xf32>
    %2 = tpu.matmul %0, %1, %cst {dimension_numbers = #tpu.dot_dimension_numbers<[1], [1], [0], [0], [0, 0, 1, 0], [], []>} : vector<8x128xf32>, vector<128x128xf32>, vector<8x128xf32> -> vector<8x128xf32>
    %c0_3 = arith.constant 0 : index
    %c0_4 = arith.constant 0 : index
    %3 = vector.load %arg3[%c0_3, %c0_4] : memref<128x128xf32, #tpu.memory_space<vmem>>, vector<128x128xf32>
    %cst_5 = arith.constant dense<0.000000e+00> : vector<8x128xf32>
    %4 = tpu.matmul %2, %3, %cst_5 {dimension_numbers = #tpu.dot_dimension_numbers<[1], [1], [0], [0], [0, 0, 1, 0], [], []>} : vector<8x128xf32>, vector<128x128xf32>, vector<8x128xf32> -> vector<8x128xf32>
    %c0_6 = arith.constant 0 : index
    %c0_7 = arith.constant 0 : index
    %5 = vector.load %arg4[%c0_6, %c0_7] : memref<8x128xf32, #tpu.memory_space<vmem>>, vector<8x128xf32>
    tpu.vector_store %arg4[%c0_6, %c0_7], %4 {strides = array<i32>} : memref<8x128xf32, #tpu.memory_space<vmem>>, vector<8x128xf32>,
    return
  }
  func.func @transform_0(%arg0: i32) -> (i32, i32) {
    %c0_i32 = arith.constant 0 : i32
    %c0_i32_0 = arith.constant 0 : i32
    return %arg0, %c0_i32 : i32, i32
  }
  func.func @transform_1(%arg0: i32) -> (i32, i32) {
    %c0_i32 = arith.constant 0 : i32
    %c0_i32_0 = arith.constant 0 : i32
    %c0_i32_1 = arith.constant 0 : i32
    return %c0_i32, %c0_i32_0 : i32, i32
  }
  func.func @transform_2(%arg0: i32) -> (i32, i32) {
    %c0_i32 = arith.constant 0 : i32
    %c0_i32_0 = arith.constant 0 : i32
    %c0_i32_1 = arith.constant 0 : i32
    return %c0_i32, %c0_i32_0 : i32, i32
  }
  func.func @transform_3(%arg0: i32) -> (i32, i32) {
    %c0_i32 = arith.constant 0 : i32
    %c0_i32_0 = arith.constant 0 : i32
    return %arg0, %c0_i32 : i32, i32
  }
}

module attributes {stable_mosaic.version = 11 : i64} {
  func.func @_fused_kernel(%arg0: i32, %arg1: memref<8x128xf32, #tpu.memory_space<vmem>>, %arg2: memref<128x128xf32, #tpu.memory_space<vmem>>, %arg3: memref<128x128xf32, #tpu.memory_space<vmem>>, %arg4: memref<8x128xf32, #tpu.memory_space<vmem>>) attributes {dimension_semantics = [#tpu.dimension_semantics<parallel>], iteration_bounds = array<i64: 2>, scalar_prefetch = 0 : i64, scratch_operands = 0 : i64, tpu.core_type = #tpu.core_type<tc>, window_params = [{transform_indices = @transform_0, window_bounds = array<i64: 8, 128>}, {pipeline_mode = #tpu.pipeline_mode<synchronous>, transform_indices = @transform_1, window_bounds = array<i64: 128, 128>}, {pipeline_mode = #tpu.pipeline_mode<synchronous>, transform_indices = @transform_2, window_bounds = array<i64: 128, 128>}, {transform_indices = @transform_3, window_bounds = array<i64: 8, 128>}]} {
    %c0 = arith.constant 0 : index
    %c0_0 = arith.constant 0 : index
    %0 = vector.load %arg1[%c0, %c0_0] : memref<8x128xf32, #tpu.memory_space<vmem>>, vector<8x128xf32>
    %c0_1 = arith.constant 0 : index
    %c0_2 = arith.constant 0 : index
    %1 = vector.load %arg2[%c0_1, %c0_2] : memref<128x128xf32, #tpu.memory_space<vmem>>, vector<128x128xf32>
    %cst = arith.constant dense<0.000000e+00> : vector<8x128xf32>
    %2 = tpu.matmul %0, %1, %cst {dimension_numbers = #tpu.dot_dimension_numbers<[1], [1], [0], [0], [0, 0, 1, 0], [], []>} : vector<8x128xf32>, vector<128x128xf32>, vector<8x128xf32> -> vector<8x128xf32>
    %c0_3 = arith.constant 0 : index
    %c0_4 = arith.constant 0 : index
    %3 = vector.load %arg3[%c0_3, %c0_4] : memref<128x128xf32, #tpu.memory_space<vmem>>, vector<128x128xf32>
    %cst_5 = arith.constant dense<0.000000e+00> : vector<8x128xf32>
    %4 = tpu.matmul %2, %3, %cst_5 {dimension_numbers = #tpu.dot_dimension_numbers<[1], [1], [0], [0], [0, 0, 1, 0], [], []>} : vector<8x128xf32>, vector<128x128xf32>, vector<8x128xf32> -> vector<8x128xf32>
    %c0_6 = arith.constant 0 : index
    %c0_7 = arith.constant 0 : index
    %5 = vector.load %arg4[%c0_6, %c0_7] : memref<8x128xf32, #tpu.memory_space<vmem>>, vector<8x128xf32>
    tpu.vector_store %arg4[%c0_6, %c0_7], %4 {strides = array<i32>} : memref<8x128xf32, #tpu.memory_space<vmem>>, vector<8x128xf32>,
    return
  }
  func.func @transform_0(%arg0: i32) -> (i32, i32) {
    %c0_i32 = arith.constant 0 : i32
    %c0_i32_0 = arith.constant 0 : i32
    return %arg0, %c0_i32 : i32, i32
  }
  func.func @transform_1(%arg0: i32) -> (i32, i32) {
    %c0_i32 = arith.constant 0 : i32
    %c0_i32_0 = arith.constant 0 : i32
    %c0_i32_1 = arith.constant 0 : i32
    return %c0_i32, %c0_i32_0 : i32, i32
  }
  func.func @transform_2(%arg0: i32) -> (i32, i32) {
    %c0_i32 = arith.constant 0 : i32
    %c0_i32_0 = arith.constant 0 : i32
    %c0_i32_1 = arith.constant 0 : i32
    return %c0_i32, %c0_i32_0 : i32, i32
  }
  func.func @transform_3(%arg0: i32) -> (i32, i32) {
    %c0_i32 = arith.constant 0 : i32
    %c0_i32_0 = arith.constant 0 : i32
    return %arg0, %c0_i32 : i32, i32
  }
}

</mosaic_0001>

<bundles_post_ra>
// kernel: tpu_custom_call.1
= control target key start
LH: loop header
LB: loop body
LE: loop exit
PB: predicated region body
PF: predicated region fallthrough
CT: control target
= control target key end

     0   :  { %8 = vsyncpa [#allocation3], 0  ;;  %s1171_s0 = inlined_call_operand.hbm [shape: f32[16,128], index: 0, kind: input, shape index: {}]   ;;  %s1172_s1 = inlined_call_operand.hbm [shape: f32[128,128], index: 1, kind: input, shape index: {}]   ;;  %s1173_s2 = inlined_call_operand.hbm [shape: f32[128,128], index: 2, kind: input, shape index: {}]   ;;  %s1174_s3 = inlined_call_operand.hbm [shape: f32[16,128], index: 3, kind: output, shape index: {}]  }
   0x1   :  { %10 = vsyncpa [#allocation3 + $0x1], 0 }
   0x2   :  { %11 = vsyncpa [#allocation6], 0 }
   0x3   :  { %12 = vsyncpa [#allocation4], 0 }
   0x4   :  { %14 = vsyncpa [#allocation4 + $0x1], 0  ;;  %s919_s12 = smov 0   ;;  %s921_s13 = smov 0  }
   0x5   :  { %s923_s14 = smov 0   ;;  %s925_s15 = smov 0  }
   0x6 LB: > { %s940_s16 = sadd.s32 4294967295, %s888_s15   ;;  %s492_s17 = sadd.s32 4294967294, %s888_s15   ;;  %s888_s15 = sphi %s925_s15, %s1194_s15   ;;  %s884_s14 = sphi %s923_s14, %s1193_s14   ;;  %s880_s13 = sphi %s921_s13, %s1192_s13   ;;  %s876_s12 = sphi %s919_s12, %s1191_s12  }
   0x7   : > { %p40_p0 = scmp.ne.s32.totalorder %s880_s13, %s876_s12  ;;  %p1175_p1 = scmp.eq.s32.totalorder %s940_s16, 0 }
   0x8   : > { %p112_p3 = scmp.eq.s32.totalorder %s492_s17, 1  ;;  %p493_p5 = scmp.ge.s32.totalorder %s888_s15, 1 }
   0x9   : > { %p949_p4 = por %p1175_p1, %p40_p0  ;;  %p119_p7 = scmp.lt.s32.totalorder %s888_s15, 3 }
   0xa   : > { %p954_p6 = por %p112_p3, %p40_p0  ;;  %s890_s21 = smov [#allocation5]  }
   0xb   : > { %s1178_s18 = scalar_select %p949_p4, 1, 0 }
   0xc   : > { %s1179_s19 = scalar_select %p954_p6, 1, 0 }
   0xd   : > { %p959_p8 = pnand %p493_p5, %p119_p7  ;;  %s131_s22 = sshll.u32 %s890_s21, 4  ;;  %s963_s22 = int_to_ptr.vmem [resolvable:$true] %s131_s22 }
   0xe   : > { %s891_s24 = smov [#allocation7]   ;;  %s732_s28 = scalar_lea.hbm %s1172_s1, 2048 }
   0xf   : > { %p672_p9 = pneg %p959_p8  ;;  %s144_s25 = sshll.u32 %s891_s24, 4  ;;  %s974_s25 = int_to_ptr.vmem [resolvable:$true] %s144_s25 }
  0x10   : > { %p733_p12 = scmp.ne.s32.totalorder %s1172_s1, %s732_s28  ;;  %p739_p5 = scmp.lt.u32.totalorder %s732_s28, %s1172_s1 }
  0x11   : > { %p970_p11 = pnand %p672_p9, %p1175_p1 }
  0x13   : > { %p734_p13 = pneg %p970_p11 }
  0x15   : > { %p735_p0 = pnand %p734_p13, %p733_p12 }
  0x17   : > { %p736_p3 = pneg %p735_p0 }
  0x19   : > { %p741_p7 = pnand %p739_p5, %p736_p3 }
  0x1b   : > { %744 = shalt.err (!%p741_p7)
}
  0x1c   : > { %s745_s6 = scalar_lea.vmem %s963_s22, 2048  ;;  %p753_p2 = scmp.lt.s32.totalorder %s963_s22, %s963_s22 }
  0x1d   : > { %p746_p9 = scmp.ne.s32.totalorder %s963_s22, %s745_s6  ;;  %p754_p12 = scmp.lt.s32.totalorder %s745_s6, %s745_s6 }
  0x1f   : > { %p748_p10 = pnand %p746_p9, %p734_p13  ;;  %p755_p0 = por %p754_p12, %p753_p2 }
  0x21   : > { %p749_p1 = pneg %p748_p10 }
  0x23   : > { %p756_p6 = pnand %p755_p0, %p749_p1 }
  0x25   : > { %759 = shalt.err (!%p756_p6)
}
  0x26   : > { %s892_s7 = smov 128   ;;  %s893_s8 = smov 8  }
  0x27   : > { %675 = dma.hbm_to_vmem [thread:$0]  (!%p970_p11), %s1172_s1, 2048, %s963_s22, [#allocation6], %s892_s7, %s892_s7, %s893_s8  }
  0x28   : > { %s760_s21 = scalar_lea.hbm %s1173_s2, 2048 }
  0x29   : > { %p761_p2 = scmp.ne.s32.totalorder %s1173_s2, %s760_s21  ;;  %p767_p10 = scmp.lt.u32.totalorder %s760_s21, %s1173_s2 }
  0x2b   : > { %p763_p1 = pnand %p761_p2, %p734_p13 }
  0x2d   : > { %p764_p6 = pneg %p763_p1 }
  0x2f   : > { %p769_p3 = pnand %p767_p10, %p764_p6 }
  0x31   : > { %772 = shalt.err (!%p769_p3)
}
  0x32   : > { %s773_s22 = scalar_lea.vmem %s974_s25, 2048  ;;  %p781_p12 = scmp.lt.s32.totalorder %s974_s25, %s974_s25 }
  0x33   : > { %p774_p5 = scmp.ne.s32.totalorder %s974_s25, %s773_s22  ;;  %p782_p0 = scmp.lt.s32.totalorder %s773_s22, %s773_s22 }
  0x35   : > { %p776_p7 = pnand %p774_p5, %p734_p13  ;;  %p783_p2 = por %p782_p0, %p781_p12 }
  0x37   : > { %p777_p9 = pneg %p776_p7 }
  0x39   : > { %p784_p1 = pnand %p783_p2, %p777_p9 }
  0x3b   : > { %787 = shalt.err (!%p784_p1)
}
  0x3c   : > { %678 = dma.hbm_to_vmem [thread:$0]  (!%p970_p11), %s1173_s2, 2048, %s974_s25, [#allocation6], %s892_s7, %s892_s7, %s893_s8  }
  0x3d   : > { %s1029_s4 = sadd.s32 1, %s888_s15   ;;  %s27_s23 = sadd.s32 1, %s884_s14 }
  0x3e   : > { %s24_s5 = ssub.s32 %s888_s15, %s1029_s4  ;;  %p34_p13 = scmp.ne.s32.totalorder %s884_s14, %s880_s13 }
  0x3f   : > { %p25_p6 = scmp.eq.s32.totalorder %s24_s5, 0  ;;  %p35_p10 = scmp.eq.s32.totalorder %s888_s15, 0 }
  0x40   : > { %p1182_p3 = scmp.eq.s32.totalorder %s940_s16, 1  ;;  %p689_p7 = scmp.lt.s32.totalorder %s888_s15, 2 }
  0x41   : > { %s1045_s9 = scalar_select %p25_p6, %s884_s14, %s27_s23  }
  0x42   : > { %p1039_p5 = por %p1182_p3, %p34_p13  ;;  %p36_p9 = por %p35_p10, %p34_p13 }
  0x43   : > { %s158_s10 = sand.u32 1, %s884_s14   ;;  %s498_s25 = sshll.u32 %s888_s15, 7 }
  0x44   : > { %s1183_s6 = scalar_select %p1039_p5, 1, 0 }
  0x45   : > { %s497_s11 = sshll.u32 %s158_s10, 3  ;;  %s1052_s17 = scalar_lea.hbm %s1171_s0, %s498_s25 }
  0x46   : > { %s162_s21 = scalar_lea.vmem [#allocation2], %s497_s11  ;;  %p1056_p11 = pnand %p689_p7, %p36_p9 }
  0x47   : > { %s169_s24 = sshll.u32 %s162_s21, 4  ;;  %s159_s27 = scalar_lea.sflag [#allocation3], %s158_s10  ;;  %s1054_s24 = int_to_ptr.vmem [resolvable:$true] %s169_s24 }
  0x48   : > { %s788_s28 = scalar_lea.hbm %s1052_s17, 128  ;;  %p790_p0 = pneg %p1056_p11 }
  0x49   : > { %p789_p12 = scmp.ne.s32.totalorder %s1052_s17, %s788_s28  ;;  %s793_s30 = scalar_lea.hbm %s1171_s0, 256 }
  0x4a   : > { %p794_p13 = scmp.lt.u32.totalorder %s1052_s17, %s1171_s0  ;;  %p795_p6 = scmp.lt.u32.totalorder %s793_s30, %s788_s28 }
  0x4b   : > { %p791_p2 = pnand %p790_p0, %p789_p12  ;;  %p797_p3 = scmp.lt.u32.totalorder %s788_s28, %s1052_s17 }
  0x4c   : > { %p796_p10 = por %p795_p6, %p794_p13 }
  0x4d   : > { %p792_p1 = pneg %p791_p2 }
  0x4e   : > { %p798_p7 = por %p797_p3, %p796_p10 }
  0x50   : > { %p799_p9 = pnand %p798_p7, %p792_p1 }
  0x52   : > { %802 = shalt.err (!%p799_p9)
}
  0x53   : > { %s803_s10 = scalar_lea.vmem %s1054_s24, 128  ;;  %s894_s11 = smov [#allocation2]  }
  0x54   : > { %p804_p12 = scmp.ne.s32.totalorder %s1054_s24, %s803_s10  ;;  %s808_s25 = sshll.u32 %s894_s11, 4  ;;  %s809_s25 = int_to_ptr.vmem [resolvable:$false] %s808_s25 }
  0x55   : > { %s810_s7 = scalar_lea.vmem %s809_s25, 256  ;;  %p811_p4 = scmp.lt.s32.totalorder %s1054_s24, %s809_s25 }
  0x56   : > { %p806_p2 = pnand %p804_p12, %p790_p0  ;;  %p812_p13 = scmp.lt.s32.totalorder %s810_s7, %s803_s10 }
  0x58   : > { %p807_p5 = pneg %p806_p2  ;;  %p813_p6 = por %p812_p13, %p811_p4 }
  0x5a   : > { %p814_p10 = pnand %p813_p6, %p807_p5 }
  0x5c   : > { %817 = shalt.err (!%p814_p10)
}
  0x5d   : > { %682 = dma.hbm_to_vmem [thread:$0]  (!%p1056_p11), %s1052_s17, 128, %s1054_s24, %s159_s27  }
  0x5e   : > { %178 = sbr.rel (%p959_p8) target bundleno = 609 (0x261), region = 32  ;;  %s1088_s8 = sand.u32 (!%p959_p8), 1, %s880_s13  }
  0x5f   : > { %s500_s21 = sshll.u32 (!%p959_p8), %s1088_s8, 3  ;;  %s181_s28 = scalar_lea.sflag (!%p959_p8), [#allocation3], %s1088_s8 }
  0x60   : > { %s1094_s22 = scalar_lea.vmem (!%p959_p8), [#allocation2], %s500_s21  ;;  %p1185_p4 = scmp.ne.s32.totalorder (!%p959_p8), %s1178_s18, 0 }
  0x65   : > { %863 = dma.done.wait (%p1185_p4), %s181_s28, 128  }
  0x66   : > { %865 = vsyncadd (%p1185_p4), %s181_s28, 4294967168  ;;  %p1186_p5 = scmp.eq.s32.totalorder %s940_s16, 0 }
  0x68   : > { %867 = dma.done.wait (%p1186_p5), [#allocation6], 4096   ;;  %p1187_p8 = pmov %p1186_p5 }
  0x69   : > { %v895_v0 = vmov 0.0|0.0   ;;  %vm896_vm0 = vmmov 0   ;;  %v897_v1 = vmov 0.0   ;;  %v216_v2 = vld [vmem:[#allocation5] sm:$0xff]  ;;  %v217_v3 = vld [vmem:[#allocation5 + $0x8] sm:$0xff]  ;;  %v218_v5 = vld [vmem:[#allocation5 + $0x10] sm:$0xff] }
  0x6a   : > { %869 = vsyncadd (%p1187_p8), [#allocation6], 4294963200  ;;  %612 = vmatprep.subr.bf16.mxu0 %v895_v0  ;;  %574 = vmatprep.mubr.msk.f32.mxu0 %vm896_vm0, %v897_v1  ;;  %v613_v4 = vpack.c.bf16 %v217_v3, %v216_v2  ;;  %v219_v6 = vld [vmem:[#allocation5 + $0x18] sm:$0xff]  ;;  %v302_v7 = vld [vmem:[#allocation7] sm:$0xff]  ;;  %s214_s18 = scalar_lea.vmem [#allocation8], %s500_s21  ;;  %s505_s17 = sshll.u32 %s940_s16, 7 }
  0x6b   : > { %636 = vmatprep.subr.bf16.mxu1 %v895_v0  ;;  %609 = vmatprep.mubr.msk.f32.mxu1 %vm896_vm0, %v897_v1  ;;  %v303_v8 = vld [vmem:[#allocation7 + $0x8] sm:$0xff]  ;;  %v616_v9 = vpack.c.bf16 %v219_v6, %v218_v5  ;;  %v304_v11 = vld [vmem:[#allocation7 + $0x10] sm:$0xff]  ;;  %v305_v12 = vld [vmem:[#allocation7 + $0x18] sm:$0xff]  ;;  %s403_s20 = sshll.u32 %s214_s18, 4  ;;  %s1129_s27 = scalar_lea.hbm %s1174_s3, %s505_s17  ;;  %s1124_s20 = int_to_ptr.vmem [resolvable:$true] %s403_s20 }
  0x6c   : > { %614 = vmatpush3.bf16.xpose.msra.mxu0 %v613_v4  ;;  %v637_v10 = vpack.c.bf16 %v303_v8, %v302_v7  ;;  %v220_v13 = vld [vmem:[#allocation5 + $0x20] sm:$0xff]  ;;  %v221_v14 = vld [vmem:[#allocation5 + $0x28] sm:$0xff]  ;;  %v640_v15 = vpack.c.bf16 %v305_v12, %v304_v11  ;;  %v222_v19 = vld [vmem:[#allocation5 + $0x30] sm:$0xff]  ;;  %s390_s29 = scalar_lea.sflag [#allocation4], %s1088_s8  ;;  %s818_s30 = scalar_lea.vmem %s1124_s20, 128 }
  0x6d   : > { %615 = vmatprep.subr.bf16.mxu0 %v895_v0  ;;  %v619_v16 = vpack.c.bf16 %v221_v14, %v220_v13  ;;  %v306_v17 = vld [vmem:[#allocation7 + $0x20] sm:$0xff]  ;;  %v307_v18 = vld [vmem:[#allocation7 + $0x28] sm:$0xff]  ;;  %v223_v20 = vld [vmem:[#allocation5 + $0x38] sm:$0xff]  ;;  %p819_p11 = scmp.ne.s32.totalorder %s1124_s20, %s818_s30  ;;  %p1188_p0 = scmp.ne.s32.totalorder %s1183_s6, 0 }
  0x6e   : > { %638 = vmatpush3.bf16.xpose.msra.mxu1 %v637_v10  ;;  %v643_v21 = vpack.c.bf16 %v307_v18, %v306_v17  ;;  %v622_v22 = vpack.c.bf16 %v223_v20, %v222_v19  ;;  %v308_v23 = vld [vmem:[#allocation7 + $0x30] sm:$0xff]  ;;  %v309_v24 = vld [vmem:[#allocation7 + $0x38] sm:$0xff]  ;;  %v224_v25 = vld [vmem:[#allocation5 + $0x40] sm:$0xff]  ;;  %s898_s16 = smov [#allocation8]  }
  0x6f   : > { %639 = vmatprep.subr.bf16.mxu1 %v895_v0  ;;  %v225_v26 = vld [vmem:[#allocation5 + $0x48] sm:$0xff]  ;;  %v646_v27 = vpack.c.bf16 %v309_v24, %v308_v23  ;;  %v310_v29 = vld [vmem:[#allocation7 + $0x40] sm:$0xff]  ;;  %v226_v31 = vld [vmem:[#allocation5 + $0x50] sm:$0xff]  ;;  %p820_p1 = pnand %p819_p11, %p1188_p0  ;;  %s822_s23 = sshll.u32 %s898_s16, 4  ;;  %s823_s23 = int_to_ptr.vmem [resolvable:$false] %s822_s23 }
  0x70   : > { %v625_v28 = vpack.c.bf16 %v225_v26, %v224_v25  ;;  %v311_v30 = vld [vmem:[#allocation7 + $0x48] sm:$0xff]  ;;  %v227_v32 = vld [vmem:[#allocation5 + $0x58] sm:$0xff]  ;;  %v312_v35 = vld [vmem:[#allocation7 + $0x50] sm:$0xff]  ;;  %s824_s5 = scalar_lea.vmem %s823_s23, 256  ;;  %p825_p7 = scmp.lt.s32.totalorder %s1124_s20, %s823_s23 }
  0x71   : > { %v649_v33 = vpack.c.bf16 %v311_v30, %v310_v29  ;;  %v628_v34 = vpack.c.bf16 %v227_v32, %v226_v31  ;;  %v313_v36 = vld [vmem:[#allocation7 + $0x58] sm:$0xff]  ;;  %v228_v37 = vld [vmem:[#allocation5 + $0x60] sm:$0xff]  ;;  %v229_v38 = vld [vmem:[#allocation5 + $0x68] sm:$0xff]  ;;  %p821_p3 = pneg %p820_p1  ;;  %p826_p9 = scmp.lt.s32.totalorder %s824_s5, %s818_s30 }
  0x72   : > { %v652_v39 = vpack.c.bf16 %v313_v36, %v312_v35  ;;  %v631_v40 = vpack.c.bf16 %v229_v38, %v228_v37  ;;  %v314_v41 = vld [vmem:[#allocation7 + $0x60] sm:$0xff]  ;;  %v315_v42 = vld [vmem:[#allocation7 + $0x68] sm:$0xff]  ;;  %v230_v43 = vld [vmem:[#allocation5 + $0x70] sm:$0xff] }
  0x73   : > { %v231_v44 = vld [vmem:[#allocation5 + $0x78] sm:$0xff]  ;;  %v655_v45 = vpack.c.bf16 %v315_v42, %v314_v41  ;;  %v316_v47 = vld [vmem:[#allocation7 + $0x70] sm:$0xff]  ;;  %p827_p12 = por %p826_p9, %p825_p7 }
  0x74   : > { %617 = vmatpush3.bf16.xpose.msra.mxu0 %v616_v9  ;;  %v634_v46 = vpack.c.bf16 %v231_v44, %v230_v43  ;;  %v317_v48 = vld [vmem:[#allocation7 + $0x78] sm:$0xff] }
  0x75   : > { %618 = vmatprep.subr.bf16.mxu0 %v895_v0  ;;  %v658_v49 = vpack.c.bf16 %v317_v48, %v316_v47  ;;  %v215_v50 = vld [vmem:[%s1094_s22] sm:$0xff]  ;;  %p828_p2 = pnand %p827_p12, %p821_p3 }
  0x76   : > { %641 = vmatpush3.bf16.xpose.msra.mxu1 %v640_v15 }
  0x77   : > { %642 = vmatprep.subr.bf16.mxu1 %v895_v0 }
  0x7c   : > { %620 = vmatpush3.bf16.xpose.msra.mxu0 %v619_v16 }
  0x7d   : > { %621 = vmatprep.subr.bf16.mxu0 %v895_v0 }
  0x7e   : > { %644 = vmatpush3.bf16.xpose.msra.mxu1 %v643_v21 }
  0x7f   : > { %645 = vmatprep.subr.bf16.mxu1 %v895_v0 }
  0x84   : > { %623 = vmatpush3.bf16.xpose.msra.mxu0 %v622_v22 }
  0x85   : > { %624 = vmatprep.subr.bf16.mxu0 %v895_v0 }
  0x86   : > { %647 = vmatpush3.bf16.xpose.msra.mxu1 %v646_v27 }
  0x87   : > { %648 = vmatprep.subr.bf16.mxu1 %v895_v0 }
  0x8c   : > { %626 = vmatpush3.bf16.xpose.msra.mxu0 %v625_v28 }
  0x8d   : > { %627 = vmatprep.subr.bf16.mxu0 %v895_v0 }
  0x8e   : > { %650 = vmatpush3.bf16.xpose.msra.mxu1 %v649_v33 }
  0x8f   : > { %651 = vmatprep.subr.bf16.mxu1 %v895_v0 }
  0x94   : > { %629 = vmatpush3.bf16.xpose.msra.mxu0 %v628_v34 }
  0x95   : > { %630 = vmatprep.subr.bf16.mxu0 %v895_v0 }
  0x96   : > { %653 = vmatpush3.bf16.xpose.msra.mxu1 %v652_v39 }
  0x97   : > { %654 = vmatprep.subr.bf16.mxu1 %v895_v0 }
  0x9c   : > { %632 = vmatpush3.bf16.xpose.msra.mxu0 %v631_v40 }
  0x9d   : > { %633 = vmatprep.subr.bf16.mxu0 %v895_v0 }
  0x9e   : > { %656 = vmatpush3.bf16.xpose.msra.mxu1 %v655_v45 }
  0x9f   : > { %657 = vmatprep.subr.bf16.mxu1 %v895_v0 }
  0xa4   : > { %635 = vmatpush3.bf16.xpose.msra.mxu0 %v634_v46 }
  0xa6   : > { %659 = vmatpush3.bf16.xpose.msra.mxu1 %v658_v49 }
  0xab   : > { %575 = vmatmul.mubr.f32.vlgmr.msra.gmra.mrb[0].mxu0 %v215_v50 }
 0x17e   : > { %v298_v51 = vpop.f32.mrb[0].mxu0 }
 0x17f   : > { %v576_v52 = vpop.f32.mrb[1].mxu0  ;;  %610 = vmatmul.mubr.f32.vlgmr.msra.gmra.mrb[0].mxu1 %v298_v51 }
 0x252   : > { %v384_v53 = vpop.f32.mrb[0].mxu1 }
 0x253   : > { %388 = vst [vmem:[%s214_s18] sm:$0xff] %v384_v53  ;;  %v611_v54 = vpop.f32.mrb[1].mxu1 }
 0x254   : > { %831 = shalt.err (!%p828_p2)
}
 0x255   : > { %s832_s10 = scalar_lea.hbm %s1129_s27, 128  ;;  %s836_s7 = scalar_lea.hbm %s1174_s3, 256 }
 0x256   : > { %p833_p13 = scmp.ne.s32.totalorder %s1129_s27, %s832_s10  ;;  %p837_p4 = scmp.lt.u32.totalorder %s1129_s27, %s1174_s3 }
 0x257   : > { %p838_p5 = scmp.lt.u32.totalorder %s836_s7, %s832_s10  ;;  %p840_p11 = scmp.lt.u32.totalorder %s832_s10, %s1129_s27 }
 0x258   : > { %p834_p6 = pnand %p833_p13, %p1188_p0 }
 0x259   : > { %p839_p8 = por %p838_p5, %p837_p4 }
 0x25a   : > { %p835_p10 = pneg %p834_p6 }
 0x25b   : > { %p841_p1 = por %p840_p11, %p839_p8 }
 0x25d   : > { %p842_p3 = pnand %p841_p1, %p835_p10 }
 0x25f   : > { %845 = shalt.err (!%p842_p3)
}
 0x260   : > { %670 = dma.vmem_to_hbm [thread:$0]  (%p1188_p0), %s1124_s20, 128, %s1129_s27, %s390_s29  }
 0x261 PF: > { %s415_s28 = sand.u32 1, %s876_s12   ;;  %p1189_p7 = scmp.ne.s32.totalorder %s1179_s19, 0 }
 0x262   : > { %p1190_p9 = scmp.ge.s32.totalorder %s888_s15, 2  ;;  %s416_s22 = scalar_lea.sflag [#allocation4], %s415_s28 }
 0x264   : > { %p684_p12 = pnand %p1190_p9, %p1189_p7 }
 0x266   : > { %871 = dma.done.wait (!%p684_p12), %s416_s22, 128  }
 0x267   : > { %873 = vsyncadd (!%p684_p12), %s416_s22, 4294967168  ;;  %p17_p2 = scmp.ge.s32.totalorder %s1029_s4, 4   ;;  %s1191_s12 = smov %s880_s13 }
 0x268   : > { %s1192_s13 = smov %s884_s14  ;;  %s1193_s14 = smov %s1045_s9 }
 0x269   : > { %s1194_s15 = smov %s1029_s4  ;;  %19 = sbr.rel (!%p17_p2) target bundleno = 6 (0x6), region = 85 }
 0x270   :  { %421 = vsyncpa [#allocation3], 1 }
 0x271   :  { %423 = vsyncpa [#allocation3 + $0x1], 1 }
 0x272   :  { %424 = vsyncpa [#allocation6], 1 }
 0x273   :  { %425 = vsyncpa [#allocation4], 1 }
 0x274   :  { %427 = vsyncpa [#allocation4 + $0x1], 1 }

// kernel: tpu_custom_call.1
= control target key start
LH: loop header
LB: loop body
LE: loop exit
PB: predicated region body
PF: predicated region fallthrough
CT: control target
= control target key end

     0   :  { %8 = vsyncpa [#allocation3], 0  ;;  %s1171_s0 = inlined_call_operand.hbm [shape: f32[16,128], index: 0, kind: input, shape index: {}]   ;;  %s1172_s1 = inlined_call_operand.hbm [shape: f32[128,128], index: 1, kind: input, shape index: {}]   ;;  %s1173_s2 = inlined_call_operand.hbm [shape: f32[128,128], index: 2, kind: input, shape index: {}]   ;;  %s1174_s3 = inlined_call_operand.hbm [shape: f32[16,128], index: 3, kind: output, shape index: {}]  }
   0x1   :  { %10 = vsyncpa [#allocation3 + $0x1], 0 }
   0x2   :  { %11 = vsyncpa [#allocation6], 0 }
   0x3   :  { %12 = vsyncpa [#allocation4], 0 }
   0x4   :  { %14 = vsyncpa [#allocation4 + $0x1], 0  ;;  %s919_s12 = smov 0   ;;  %s921_s13 = smov 0  }
   0x5   :  { %s923_s14 = smov 0   ;;  %s925_s15 = smov 0  }
   0x6 LB: > { %s940_s16 = sadd.s32 4294967295, %s888_s15   ;;  %s492_s17 = sadd.s32 4294967294, %s888_s15   ;;  %s888_s15 = sphi %s925_s15, %s1194_s15   ;;  %s884_s14 = sphi %s923_s14, %s1193_s14   ;;  %s880_s13 = sphi %s921_s13, %s1192_s13   ;;  %s876_s12 = sphi %s919_s12, %s1191_s12  }
   0x7   : > { %p40_p0 = scmp.ne.s32.totalorder %s880_s13, %s876_s12  ;;  %p1175_p1 = scmp.eq.s32.totalorder %s940_s16, 0 }
   0x8   : > { %p112_p3 = scmp.eq.s32.totalorder %s492_s17, 1  ;;  %p493_p5 = scmp.ge.s32.totalorder %s888_s15, 1 }
   0x9   : > { %p949_p4 = por %p1175_p1, %p40_p0  ;;  %p119_p7 = scmp.lt.s32.totalorder %s888_s15, 3 }
   0xa   : > { %p954_p6 = por %p112_p3, %p40_p0  ;;  %s890_s21 = smov [#allocation5]  }
   0xb   : > { %s1178_s18 = scalar_select %p949_p4, 1, 0 }
   0xc   : > { %s1179_s19 = scalar_select %p954_p6, 1, 0 }
   0xd   : > { %p959_p8 = pnand %p493_p5, %p119_p7  ;;  %s131_s22 = sshll.u32 %s890_s21, 4  ;;  %s963_s22 = int_to_ptr.vmem [resolvable:$true] %s131_s22 }
   0xe   : > { %s891_s24 = smov [#allocation7]   ;;  %s732_s28 = scalar_lea.hbm %s1172_s1, 2048 }
   0xf   : > { %p672_p9 = pneg %p959_p8  ;;  %s144_s25 = sshll.u32 %s891_s24, 4  ;;  %s974_s25 = int_to_ptr.vmem [resolvable:$true] %s144_s25 }
  0x10   : > { %p733_p12 = scmp.ne.s32.totalorder %s1172_s1, %s732_s28  ;;  %p739_p5 = scmp.lt.u32.totalorder %s732_s28, %s1172_s1 }
  0x11   : > { %p970_p11 = pnand %p672_p9, %p1175_p1 }
  0x13   : > { %p734_p13 = pneg %p970_p11 }
  0x15   : > { %p735_p0 = pnand %p734_p13, %p733_p12 }
  0x17   : > { %p736_p3 = pneg %p735_p0 }
  0x19   : > { %p741_p7 = pnand %p739_p5, %p736_p3 }
  0x1b   : > { %744 = shalt.err (!%p741_p7)
}
  0x1c   : > { %s745_s6 = scalar_lea.vmem %s963_s22, 2048  ;;  %p753_p2 = scmp.lt.s32.totalorder %s963_s22, %s963_s22 }
  0x1d   : > { %p746_p9 = scmp.ne.s32.totalorder %s963_s22, %s745_s6  ;;  %p754_p12 = scmp.lt.s32.totalorder %s745_s6, %s745_s6 }
  0x1f   : > { %p748_p10 = pnand %p746_p9, %p734_p13  ;;  %p755_p0 = por %p754_p12, %p753_p2 }
  0x21   : > { %p749_p1 = pneg %p748_p10 }
  0x23   : > { %p756_p6 = pnand %p755_p0, %p749_p1 }
  0x25   : > { %759 = shalt.err (!%p756_p6)
}
  0x26   : > { %s892_s7 = smov 128   ;;  %s893_s8 = smov 8  }
  0x27   : > { %675 = dma.hbm_to_vmem [thread:$0]  (!%p970_p11), %s1172_s1, 2048, %s963_s22, [#allocation6], %s892_s7, %s892_s7, %s893_s8  }
  0x28   : > { %s760_s21 = scalar_lea.hbm %s1173_s2, 2048 }
  0x29   : > { %p761_p2 = scmp.ne.s32.totalorder %s1173_s2, %s760_s21  ;;  %p767_p10 = scmp.lt.u32.totalorder %s760_s21, %s1173_s2 }
  0x2b   : > { %p763_p1 = pnand %p761_p2, %p734_p13 }
  0x2d   : > { %p764_p6 = pneg %p763_p1 }
  0x2f   : > { %p769_p3 = pnand %p767_p10, %p764_p6 }
  0x31   : > { %772 = shalt.err (!%p769_p3)
}
  0x32   : > { %s773_s22 = scalar_lea.vmem %s974_s25, 2048  ;;  %p781_p12 = scmp.lt.s32.totalorder %s974_s25, %s974_s25 }
  0x33   : > { %p774_p5 = scmp.ne.s32.totalorder %s974_s25, %s773_s22  ;;  %p782_p0 = scmp.lt.s32.totalorder %s773_s22, %s773_s22 }
  0x35   : > { %p776_p7 = pnand %p774_p5, %p734_p13  ;;  %p783_p2 = por %p782_p0, %p781_p12 }
  0x37   : > { %p777_p9 = pneg %p776_p7 }
  0x39   : > { %p784_p1 = pnand %p783_p2, %p777_p9 }
  0x3b   : > { %787 = shalt.err (!%p784_p1)
}
  0x3c   : > { %678 = dma.hbm_to_vmem [thread:$0]  (!%p970_p11), %s1173_s2, 2048, %s974_s25, [#allocation6], %s892_s7, %s892_s7, %s893_s8  }
  0x3d   : > { %s1029_s4 = sadd.s32 1, %s888_s15   ;;  %s27_s23 = sadd.s32 1, %s884_s14 }
  0x3e   : > { %s24_s5 = ssub.s32 %s888_s15, %s1029_s4  ;;  %p34_p13 = scmp.ne.s32.totalorder %s884_s14, %s880_s13 }
  0x3f   : > { %p25_p6 = scmp.eq.s32.totalorder %s24_s5, 0  ;;  %p35_p10 = scmp.eq.s32.totalorder %s888_s15, 0 }
  0x40   : > { %p1182_p3 = scmp.eq.s32.totalorder %s940_s16, 1  ;;  %p689_p7 = scmp.lt.s32.totalorder %s888_s15, 2 }
  0x41   : > { %s1045_s9 = scalar_select %p25_p6, %s884_s14, %s27_s23  }
  0x42   : > { %p1039_p5 = por %p1182_p3, %p34_p13  ;;  %p36_p9 = por %p35_p10, %p34_p13 }
  0x43   : > { %s158_s10 = sand.u32 1, %s884_s14   ;;  %s498_s25 = sshll.u32 %s888_s15, 7 }
  0x44   : > { %s1183_s6 = scalar_select %p1039_p5, 1, 0 }
  0x45   : > { %s497_s11 = sshll.u32 %s158_s10, 3  ;;  %s1052_s17 = scalar_lea.hbm %s1171_s0, %s498_s25 }
  0x46   : > { %s162_s21 = scalar_lea.vmem [#allocation2], %s497_s11  ;;  %p1056_p11 = pnand %p689_p7, %p36_p9 }
  0x47   : > { %s169_s24 = sshll.u32 %s162_s21, 4  ;;  %s159_s27 = scalar_lea.sflag [#allocation3], %s158_s10  ;;  %s1054_s24 = int_to_ptr.vmem [resolvable:$true] %s169_s24 }
  0x48   : > { %s788_s28 = scalar_lea.hbm %s1052_s17, 128  ;;  %p790_p0 = pneg %p1056_p11 }
  0x49   : > { %p789_p12 = scmp.ne.s32.totalorder %s1052_s17, %s788_s28  ;;  %s793_s30 = scalar_lea.hbm %s1171_s0, 256 }
  0x4a   : > { %p794_p13 = scmp.lt.u32.totalorder %s1052_s17, %s1171_s0  ;;  %p795_p6 = scmp.lt.u32.totalorder %s793_s30, %s788_s28 }
  0x4b   : > { %p791_p2 = pnand %p790_p0, %p789_p12  ;;  %p797_p3 = scmp.lt.u32.totalorder %s788_s28, %s1052_s17 }
  0x4c   : > { %p796_p10 = por %p795_p6, %p794_p13 }
  0x4d   : > { %p792_p1 = pneg %p791_p2 }
  0x4e   : > { %p798_p7 = por %p797_p3, %p796_p10 }
  0x50   : > { %p799_p9 = pnand %p798_p7, %p792_p1 }
  0x52   : > { %802 = shalt.err (!%p799_p9)
}
  0x53   : > { %s803_s10 = scalar_lea.vmem %s1054_s24, 128  ;;  %s894_s11 = smov [#allocation2]  }
  0x54   : > { %p804_p12 = scmp.ne.s32.totalorder %s1054_s24, %s803_s10  ;;  %s808_s25 = sshll.u32 %s894_s11, 4  ;;  %s809_s25 = int_to_ptr.vmem [resolvable:$false] %s808_s25 }
  0x55   : > { %s810_s7 = scalar_lea.vmem %s809_s25, 256  ;;  %p811_p4 = scmp.lt.s32.totalorder %s1054_s24, %s809_s25 }
  0x56   : > { %p806_p2 = pnand %p804_p12, %p790_p0  ;;  %p812_p13 = scmp.lt.s32.totalorder %s810_s7, %s803_s10 }
  0x58   : > { %p807_p5 = pneg %p806_p2  ;;  %p813_p6 = por %p812_p13, %p811_p4 }
  0x5a   : > { %p814_p10 = pnand %p813_p6, %p807_p5 }
  0x5c   : > { %817 = shalt.err (!%p814_p10)
}
  0x5d   : > { %682 = dma.hbm_to_vmem [thread:$0]  (!%p1056_p11), %s1052_s17, 128, %s1054_s24, %s159_s27  }
  0x5e   : > { %178 = sbr.rel (%p959_p8) target bundleno = 609 (0x261), region = 32  ;;  %s1088_s8 = sand.u32 (!%p959_p8), 1, %s880_s13  }
  0x5f   : > { %s500_s21 = sshll.u32 (!%p959_p8), %s1088_s8, 3  ;;  %s181_s28 = scalar_lea.sflag (!%p959_p8), [#allocation3], %s1088_s8 }
  0x60   : > { %s1094_s22 = scalar_lea.vmem (!%p959_p8), [#allocation2], %s500_s21  ;;  %p1185_p4 = scmp.ne.s32.totalorder (!%p959_p8), %s1178_s18, 0 }
  0x65   : > { %863 = dma.done.wait (%p1185_p4), %s181_s28, 128  }
  0x66   : > { %865 = vsyncadd (%p1185_p4), %s181_s28, 4294967168  ;;  %p1186_p5 = scmp.eq.s32.totalorder %s940_s16, 0 }
  0x68   : > { %867 = dma.done.wait (%p1186_p5), [#allocation6], 4096   ;;  %p1187_p8 = pmov %p1186_p5 }
  0x69   : > { %v895_v0 = vmov 0.0|0.0   ;;  %vm896_vm0 = vmmov 0   ;;  %v897_v1 = vmov 0.0   ;;  %v216_v2 = vld [vmem:[#allocation5] sm:$0xff]  ;;  %v217_v3 = vld [vmem:[#allocation5 + $0x8] sm:$0xff]  ;;  %v218_v5 = vld [vmem:[#allocation5 + $0x10] sm:$0xff] }
  0x6a   : > { %869 = vsyncadd (%p1187_p8), [#allocation6], 4294963200  ;;  %612 = vmatprep.subr.bf16.mxu0 %v895_v0  ;;  %574 = vmatprep.mubr.msk.f32.mxu0 %vm896_vm0, %v897_v1  ;;  %v613_v4 = vpack.c.bf16 %v217_v3, %v216_v2  ;;  %v219_v6 = vld [vmem:[#allocation5 + $0x18] sm:$0xff]  ;;  %v302_v7 = vld [vmem:[#allocation7] sm:$0xff]  ;;  %s214_s18 = scalar_lea.vmem [#allocation8], %s500_s21  ;;  %s505_s17 = sshll.u32 %s940_s16, 7 }
  0x6b   : > { %636 = vmatprep.subr.bf16.mxu1 %v895_v0  ;;  %609 = vmatprep.mubr.msk.f32.mxu1 %vm896_vm0, %v897_v1  ;;  %v303_v8 = vld [vmem:[#allocation7 + $0x8] sm:$0xff]  ;;  %v616_v9 = vpack.c.bf16 %v219_v6, %v218_v5  ;;  %v304_v11 = vld [vmem:[#allocation7 + $0x10] sm:$0xff]  ;;  %v305_v12 = vld [vmem:[#allocation7 + $0x18] sm:$0xff]  ;;  %s403_s20 = sshll.u32 %s214_s18, 4  ;;  %s1129_s27 = scalar_lea.hbm %s1174_s3, %s505_s17  ;;  %s1124_s20 = int_to_ptr.vmem [resolvable:$true] %s403_s20 }
  0x6c   : > { %614 = vmatpush3.bf16.xpose.msra.mxu0 %v613_v4  ;;  %v637_v10 = vpack.c.bf16 %v303_v8, %v302_v7  ;;  %v220_v13 = vld [vmem:[#allocation5 + $0x20] sm:$0xff]  ;;  %v221_v14 = vld [vmem:[#allocation5 + $0x28] sm:$0xff]  ;;  %v640_v15 = vpack.c.bf16 %v305_v12, %v304_v11  ;;  %v222_v19 = vld [vmem:[#allocation5 + $0x30] sm:$0xff]  ;;  %s390_s29 = scalar_lea.sflag [#allocation4], %s1088_s8  ;;  %s818_s30 = scalar_lea.vmem %s1124_s20, 128 }
  0x6d   : > { %615 = vmatprep.subr.bf16.mxu0 %v895_v0  ;;  %v619_v16 = vpack.c.bf16 %v221_v14, %v220_v13  ;;  %v306_v17 = vld [vmem:[#allocation7 + $0x20] sm:$0xff]  ;;  %v307_v18 = vld [vmem:[#allocation7 + $0x28] sm:$0xff]  ;;  %v223_v20 = vld [vmem:[#allocation5 + $0x38] sm:$0xff]  ;;  %p819_p11 = scmp.ne.s32.totalorder %s1124_s20, %s818_s30  ;;  %p1188_p0 = scmp.ne.s32.totalorder %s1183_s6, 0 }
  0x6e   : > { %638 = vmatpush3.bf16.xpose.msra.mxu1 %v637_v10  ;;  %v643_v21 = vpack.c.bf16 %v307_v18, %v306_v17  ;;  %v622_v22 = vpack.c.bf16 %v223_v20, %v222_v19  ;;  %v308_v23 = vld [vmem:[#allocation7 + $0x30] sm:$0xff]  ;;  %v309_v24 = vld [vmem:[#allocation7 + $0x38] sm:$0xff]  ;;  %v224_v25 = vld [vmem:[#allocation5 + $0x40] sm:$0xff]  ;;  %s898_s16 = smov [#allocation8]  }
  0x6f   : > { %639 = vmatprep.subr.bf16.mxu1 %v895_v0  ;;  %v225_v26 = vld [vmem:[#allocation5 + $0x48] sm:$0xff]  ;;  %v646_v27 = vpack.c.bf16 %v309_v24, %v308_v23  ;;  %v310_v29 = vld [vmem:[#allocation7 + $0x40] sm:$0xff]  ;;  %v226_v31 = vld [vmem:[#allocation5 + $0x50] sm:$0xff]  ;;  %p820_p1 = pnand %p819_p11, %p1188_p0  ;;  %s822_s23 = sshll.u32 %s898_s16, 4  ;;  %s823_s23 = int_to_ptr.vmem [resolvable:$false] %s822_s23 }
  0x70   : > { %v625_v28 = vpack.c.bf16 %v225_v26, %v224_v25  ;;  %v311_v30 = vld [vmem:[#allocation7 + $0x48] sm:$0xff]  ;;  %v227_v32 = vld [vmem:[#allocation5 + $0x58] sm:$0xff]  ;;  %v312_v35 = vld [vmem:[#allocation7 + $0x50] sm:$0xff]  ;;  %s824_s5 = scalar_lea.vmem %s823_s23, 256  ;;  %p825_p7 = scmp.lt.s32.totalorder %s1124_s20, %s823_s23 }
  0x71   : > { %v649_v33 = vpack.c.bf16 %v311_v30, %v310_v29  ;;  %v628_v34 = vpack.c.bf16 %v227_v32, %v226_v31  ;;  %v313_v36 = vld [vmem:[#allocation7 + $0x58] sm:$0xff]  ;;  %v228_v37 = vld [vmem:[#allocation5 + $0x60] sm:$0xff]  ;;  %v229_v38 = vld [vmem:[#allocation5 + $0x68] sm:$0xff]  ;;  %p821_p3 = pneg %p820_p1  ;;  %p826_p9 = scmp.lt.s32.totalorder %s824_s5, %s818_s30 }
  0x72   : > { %v652_v39 = vpack.c.bf16 %v313_v36, %v312_v35  ;;  %v631_v40 = vpack.c.bf16 %v229_v38, %v228_v37  ;;  %v314_v41 = vld [vmem:[#allocation7 + $0x60] sm:$0xff]  ;;  %v315_v42 = vld [vmem:[#allocation7 + $0x68] sm:$0xff]  ;;  %v230_v43 = vld [vmem:[#allocation5 + $0x70] sm:$0xff] }
  0x73   : > { %v231_v44 = vld [vmem:[#allocation5 + $0x78] sm:$0xff]  ;;  %v655_v45 = vpack.c.bf16 %v315_v42, %v314_v41  ;;  %v316_v47 = vld [vmem:[#allocation7 + $0x70] sm:$0xff]  ;;  %p827_p12 = por %p826_p9, %p825_p7 }
  0x74   : > { %617 = vmatpush3.bf16.xpose.msra.mxu0 %v616_v9  ;;  %v634_v46 = vpack.c.bf16 %v231_v44, %v230_v43  ;;  %v317_v48 = vld [vmem:[#allocation7 + $0x78] sm:$0xff] }
  0x75   : > { %618 = vmatprep.subr.bf16.mxu0 %v895_v0  ;;  %v658_v49 = vpack.c.bf16 %v317_v48, %v316_v47  ;;  %v215_v50 = vld [vmem:[%s1094_s22] sm:$0xff]  ;;  %p828_p2 = pnand %p827_p12, %p821_p3 }
  0x76   : > { %641 = vmatpush3.bf16.xpose.msra.mxu1 %v640_v15 }
  0x77   : > { %642 = vmatprep.subr.bf16.mxu1 %v895_v0 }
  0x7c   : > { %620 = vmatpush3.bf16.xpose.msra.mxu0 %v619_v16 }
  0x7d   : > { %621 = vmatprep.subr.bf16.mxu0 %v895_v0 }
  0x7e   : > { %644 = vmatpush3.bf16.xpose.msra.mxu1 %v643_v21 }
  0x7f   : > { %645 = vmatprep.subr.bf16.mxu1 %v895_v0 }
  0x84   : > { %623 = vmatpush3.bf16.xpose.msra.mxu0 %v622_v22 }
  0x85   : > { %624 = vmatprep.subr.bf16.mxu0 %v895_v0 }
  0x86   : > { %647 = vmatpush3.bf16.xpose.msra.mxu1 %v646_v27 }
  0x87   : > { %648 = vmatprep.subr.bf16.mxu1 %v895_v0 }
  0x8c   : > { %626 = vmatpush3.bf16.xpose.msra.mxu0 %v625_v28 }
  0x8d   : > { %627 = vmatprep.subr.bf16.mxu0 %v895_v0 }
  0x8e   : > { %650 = vmatpush3.bf16.xpose.msra.mxu1 %v649_v33 }
  0x8f   : > { %651 = vmatprep.subr.bf16.mxu1 %v895_v0 }
  0x94   : > { %629 = vmatpush3.bf16.xpose.msra.mxu0 %v628_v34 }
  0x95   : > { %630 = vmatprep.subr.bf16.mxu0 %v895_v0 }
  0x96   : > { %653 = vmatpush3.bf16.xpose.msra.mxu1 %v652_v39 }
  0x97   : > { %654 = vmatprep.subr.bf16.mxu1 %v895_v0 }
  0x9c   : > { %632 = vmatpush3.bf16.xpose.msra.mxu0 %v631_v40 }
  0x9d   : > { %633 = vmatprep.subr.bf16.mxu0 %v895_v0 }
  0x9e   : > { %656 = vmatpush3.bf16.xpose.msra.mxu1 %v655_v45 }
  0x9f   : > { %657 = vmatprep.subr.bf16.mxu1 %v895_v0 }
  0xa4   : > { %635 = vmatpush3.bf16.xpose.msra.mxu0 %v634_v46 }
  0xa6   : > { %659 = vmatpush3.bf16.xpose.msra.mxu1 %v658_v49 }
  0xab   : > { %575 = vmatmul.mubr.f32.vlgmr.msra.gmra.mrb[0].mxu0 %v215_v50 }
 0x17e   : > { %v298_v51 = vpop.f32.mrb[0].mxu0 }
 0x17f   : > { %v576_v52 = vpop.f32.mrb[1].mxu0  ;;  %610 = vmatmul.mubr.f32.vlgmr.msra.gmra.mrb[0].mxu1 %v298_v51 }
 0x252   : > { %v384_v53 = vpop.f32.mrb[0].mxu1 }
 0x253   : > { %388 = vst [vmem:[%s214_s18] sm:$0xff] %v384_v53  ;;  %v611_v54 = vpop.f32.mrb[1].mxu1 }
 0x254   : > { %831 = shalt.err (!%p828_p2)
}
 0x255   : > { %s832_s10 = scalar_lea.hbm %s1129_s27, 128  ;;  %s836_s7 = scalar_lea.hbm %s1174_s3, 256 }
 0x256   : > { %p833_p13 = scmp.ne.s32.totalorder %s1129_s27, %s832_s10  ;;  %p837_p4 = scmp.lt.u32.totalorder %s1129_s27, %s1174_s3 }
 0x257   : > { %p838_p5 = scmp.lt.u32.totalorder %s836_s7, %s832_s10  ;;  %p840_p11 = scmp.lt.u32.totalorder %s832_s10, %s1129_s27 }
 0x258   : > { %p834_p6 = pnand %p833_p13, %p1188_p0 }
 0x259   : > { %p839_p8 = por %p838_p5, %p837_p4 }
 0x25a   : > { %p835_p10 = pneg %p834_p6 }
 0x25b   : > { %p841_p1 = por %p840_p11, %p839_p8 }
 0x25d   : > { %p842_p3 = pnand %p841_p1, %p835_p10 }
 0x25f   : > { %845 = shalt.err (!%p842_p3)
}
 0x260   : > { %670 = dma.vmem_to_hbm [thread:$0]  (%p1188_p0), %s1124_s20, 128, %s1129_s27, %s390_s29  }
 0x261 PF: > { %s415_s28 = sand.u32 1, %s876_s12   ;;  %p1189_p7 = scmp.ne.s32.totalorder %s1179_s19, 0 }
 0x262   : > { %p1190_p9 = scmp.ge.s32.totalorder %s888_s15, 2  ;;  %s416_s22 = scalar_lea.sflag [#allocation4], %s415_s28 }
 0x264   : > { %p684_p12 = pnand %p1190_p9, %p1189_p7 }
 0x266   : > { %871 = dma.done.wait (!%p684_p12), %s416_s22, 128  }
 0x267   : > { %873 = vsyncadd (!%p684_p12), %s416_s22, 4294967168  ;;  %p17_p2 = scmp.ge.s32.totalorder %s1029_s4, 4   ;;  %s1191_s12 = smov %s880_s13 }
 0x268   : > { %s1192_s13 = smov %s884_s14  ;;  %s1193_s14 = smov %s1045_s9 }
 0x269   : > { %s1194_s15 = smov %s1029_s4  ;;  %19 = sbr.rel (!%p17_p2) target bundleno = 6 (0x6), region = 85 }
 0x270   :  { %421 = vsyncpa [#allocation3], 1 }
 0x271   :  { %423 = vsyncpa [#allocation3 + $0x1], 1 }
 0x272   :  { %424 = vsyncpa [#allocation6], 1 }
 0x273   :  { %425 = vsyncpa [#allocation4], 1 }
 0x274   :  { %427 = vsyncpa [#allocation4 + $0x1], 1 }

</bundles_post_ra>
